<compile_context>
chip_gen: v7x
topology: tpu7x:2x2x1
jax: 0.10.0
libtpu: 0.0.40
codegen_flags: <defaults>
</compile_context>

<pallas_src>
import jax
import jax.numpy as jnp
from jax.experimental import pallas as pl
from jax.experimental.pallas import tpu as pltpu

FPAD = 128   # lane-dense feature width (all feature axes padded to this)
NP = 128     # padded merged node dim (B*N rounded up to 128)
GP = 8       # padded merged graph dim (f32 sublane tile)


# ----------------------------------------------------------------------------
# Pallas kernel: whole forward pass for one merged group (one grid step)
# ----------------------------------------------------------------------------
def net_kernel(a_ref, x_ref, pa_ref, w_ref, bias_ref, out_ref):
    a = a_ref[...]            # [NP, NP]    bf16 block-diag normalized adjacency
    h = x_ref[...]            # [NP, FPAD]  bf16 node features (zero-padded)

    # conv1..conv3:  h <- ReLU(A_hat @ (h @ W_li) + b_li)
    for li in range(3):
        t = jnp.dot(h, w_ref[li], preferred_element_type=jnp.float32).astype(jnp.bfloat16)
        h32 = jnp.dot(a, t, preferred_element_type=jnp.float32) + bias_ref[li:li + 1, :]
        h = jnp.maximum(h32, 0.0).astype(jnp.bfloat16)

    # fused conv4 + global_mean_pool + fc:
    #   pool @ (A @ (h @ W4) + b4) @ Wfc + bfc == (PA @ h) @ (W4 @ Wfc) + (b4 @ Wfc + bfc)
    pooled = jnp.dot(pa_ref[...], h, preferred_element_type=jnp.float32)   # [GP, FPAD]

    # TODO(synk): nn.Dropout(p=0.25) is identity in eval mode; training-mode RNG dropout omitted.

    out_ref[...] = (jnp.dot(pooled.astype(jnp.bfloat16), w_ref[3],
                            preferred_element_type=jnp.float32)
                    + bias_ref[3:4, :])


def net_forward(a_g, x_g, pa_g, w_stack, bias_stack):
    """a_g: [NG,NP,NP] bf16, x_g: [NG,NP,FPAD] bf16, pa_g: [NG,GP,NP] bf16,
    w_stack: [4,FPAD,FPAD] bf16 (W1,W2,W3,Wcomb), bias_stack: [8,FPAD] f32
    (rows 0-2 = b1..b3, row 3 = bcomb).  Returns [NG, GP, FPAD] f32."""
    NG, np_, _ = a_g.shape
    gp = pa_g.shape[1]
    nw = w_stack.shape[0]

    return pl.pallas_call(
        net_kernel,
        out_shape=jax.ShapeDtypeStruct((NG, gp, FPAD), jnp.float32),
        grid=(NG,),
        in_specs=[
            pl.BlockSpec((pl.Squeezed(), np_, np_), lambda g: (g, 0, 0)),    # A_hat (per group)
            pl.BlockSpec((pl.Squeezed(), np_, FPAD), lambda g: (g, 0, 0)),   # X     (per group)
            pl.BlockSpec((pl.Squeezed(), gp, np_), lambda g: (g, 0, 0)),     # PA    (per group)
            pl.BlockSpec((nw, FPAD, FPAD), lambda g: (0, 0, 0)),             # weights (resident)
            pl.BlockSpec((8, FPAD), lambda g: (0, 0)),                       # biases  (resident)
        ],
        out_specs=pl.BlockSpec((pl.Squeezed(), gp, FPAD), lambda g: (g, 0, 0)),
        compiler_params=pltpu.CompilerParams(dimension_semantics=("parallel",)),
    )(a_g, x_g, pa_g, w_stack, bias_stack)


# ----------------------------------------------------------------------------
# Glue: normalized adjacency and mean-pooling matrix (plain JAX)
# ----------------------------------------------------------------------------
def build_gcn_norm_adj(edge_index, num_nodes):
    """A_hat = D^{-1/2} (A + I) D^{-1/2}; scatter-ADD so duplicate edges sum
    like PyG GCNConv. Messages flow src -> dst (row = receiver)."""
    src, dst = edge_index
    adj = jnp.zeros((num_nodes, num_nodes), jnp.float32)
    adj = adj.at[dst, src].add(1.0)
    adj = adj + jnp.eye(num_nodes, dtype=jnp.float32)   # self loops
    deg = adj.sum(axis=1)
    d_inv_sqrt = jnp.where(deg > 0, 1.0 / jnp.sqrt(deg), 0.0)
    return adj * d_inv_sqrt[:, None] * d_inv_sqrt[None, :]


def build_mean_pool(batch, num_graphs, num_nodes):
    onehot = (batch[None, :] == jnp.arange(num_graphs)[:, None]).astype(jnp.float32)
    counts = onehot.sum(axis=1, keepdims=True)
    return onehot / jnp.maximum(counts, 1.0)      # [G, N]


def pad2(m, rows=FPAD, cols=FPAD):
    return jnp.zeros((rows, cols), m.dtype).at[:m.shape[0], :m.shape[1]].set(m)


# ----------------------------------------------------------------------------
# Main
# ----------------------------------------------------------------------------
if __name__ == "__main__":
    key = jax.random.PRNGKey(0)

    B = 2             # independent graph-batches (block-diag merged into 1 group)
    N = 16            # nodes per batch (2 graphs x 8 nodes)
    G = 2             # graphs per batch
    F_in = 8
    n1, n2, n3, n4 = 32, 32, 16, 16
    num_classes = 4

    # edges: rings (both directions); second batch adds one chord per graph
    def batch_edges(add_chord):
        e = []
        for g in range(G):
            base = g * 8
            for i in range(8):
                a0, b0 = base + i, base + (i + 1) % 8
                e.append((a0, b0)); e.append((b0, a0))
            if add_chord:
                e.append((base + 0, base + 4)); e.append((base + 4, base + 0))
        return jnp.array(e, jnp.int32).T     # [2, E]

    edge_indices = [batch_edges(False), batch_edges(True)]
    batch_assign = jnp.repeat(jnp.arange(G, dtype=jnp.int32), 8)

    x_list, a_list, pool_list = [], [], []
    for bi in range(B):
        key, kx = jax.random.split(key)
        x_list.append(jax.random.normal(kx, (N, F_in), jnp.float32))
        a_list.append(build_gcn_norm_adj(edge_indices[bi], N))
        pool_list.append(build_mean_pool(batch_assign, G, N))

    # parameters (glorot-ish weights, small random biases)
    dims = [(F_in, n1), (n1, n2), (n2, n3), (n3, n4)]
    ws, bs = [], []
    for (fi, fo) in dims:
        key, kw, kb = jax.random.split(key, 3)
        ws.append(jax.random.normal(kw, (fi, fo), jnp.float32) * (1.0 / jnp.sqrt(fi)))
        bs.append(jax.random.normal(kb, (fo,), jnp.float32) * 0.1)
    key, kw, kb = jax.random.split(key, 3)
    wfc = jax.random.normal(kw, (n4, num_classes), jnp.float32) * (1.0 / jnp.sqrt(n4))
    bfc = jax.random.normal(kb, (num_classes,), jnp.float32) * 0.1

    # ---- block-diagonal batch merge + node/graph padding (all in f32) ----
    assert B * N <= NP and B * G <= GP
    a_merged = jnp.zeros((NP, NP), jnp.float32)
    x_merged = jnp.zeros((NP, FPAD), jnp.float32)
    pa_merged = jnp.zeros((GP, NP), jnp.float32)
    for bi in range(B):
        r0, g0 = bi * N, bi * G
        a_merged = a_merged.at[r0:r0 + N, r0:r0 + N].set(a_list[bi])
        x_merged = x_merged.at[r0:r0 + N, :F_in].set(x_list[bi])
        # PA = pool @ A_hat, precomputed in f32 (part of conv4+pool+fc fusion)
        pa_merged = pa_merged.at[g0:g0 + G, r0:r0 + N].set(pool_list[bi] @ a_list[bi])

    # ---- algebraic fusion of conv4 + pool + fc (f32 in glue) ----
    w_comb = ws[3] @ wfc                 # [n3, num_classes]
    b_comb = bs[3] @ wfc + bfc           # [num_classes]

    # ---- lane-dense weight / bias packing (single resident weight tensor) ----
    w_stack = jnp.stack([pad2(ws[0]), pad2(ws[1]), pad2(ws[2]),
                         pad2(w_comb)]).astype(jnp.bfloat16)          # [4,128,128]
    bias_stack = jnp.zeros((8, FPAD), jnp.float32)
    for li in range(3):
        bias_stack = bias_stack.at[li, :bs[li].shape[0]].set(bs[li])
    bias_stack = bias_stack.at[3, :num_classes].set(b_comb)

    # group axis: 1 fat step (on v7x with large B*N, split into 2 groups instead)
    a_g = a_merged.astype(jnp.bfloat16)[None]      # [1, NP, NP]
    x_g = x_merged.astype(jnp.bfloat16)[None]      # [1, NP, FPAD]
    pa_g = pa_merged.astype(jnp.bfloat16)[None]    # [1, GP, NP]

    out_pad = net_forward(a_g, x_g, pa_g, w_stack, bias_stack)
    out_pad = jax.block_until_ready(out_pad)
    out = out_pad[0, :B * G, :num_classes].reshape(B, G, num_classes)

    # reference 1: same bf16 math / same fused contraction order (tight check)
    def mimic(ab, xb, pab):
        h = xb
        for li in range(3):
            t = jnp.dot(h, w_stack[li], preferred_element_type=jnp.float32).astype(jnp.bfloat16)
            h32 = jnp.dot(ab, t, preferred_element_type=jnp.float32) + bias_stack[li:li + 1, :]
            h = jnp.maximum(h32, 0.0).astype(jnp.bfloat16)
        pooled = jnp.dot(pab, h, preferred_element_type=jnp.float32)
        return (jnp.dot(pooled.astype(jnp.bfloat16), w_stack[3],
                        preferred_element_type=jnp.float32) + bias_stack[3:4, :])

    ref_bf16 = mimic(a_g[0], x_g[0], pa_g[0])[:B * G, :num_classes].reshape(B, G, num_classes)

    # reference 2: pure f32, original unfused/unpadded shapes (semantic sanity check)
    def ref_f32(ab, xb, pb):
        h = xb
        for li, (w, b) in enumerate(zip(ws, bs)):
            h = ab @ (h @ w) + b[None, :]
            if li < 3:
                h = jnp.maximum(h, 0.0)
        pooled = pb @ h
        return pooled @ wfc + bfc[None, :]

    ref32 = jnp.stack([ref_f32(a_list[i], x_list[i], pool_list[i]) for i in range(B)])

    assert out.shape == (B, G, num_classes)
    assert jnp.allclose(out, ref_bf16, atol=1e-3, rtol=1e-3), "mismatch vs bf16 fused reference"
    assert jnp.allclose(out, ref32, atol=5e-2, rtol=5e-2), "mismatch vs f32 reference"

    print("KERNEL_OK")
</pallas_src>

<mosaic_0001>
module attributes {stable_mosaic.version = 11 : i64} {
  func.func @net_kernel(%arg0: i32, %arg1: memref<1x128x128xbf16, #tpu.memory_space<vmem>>, %arg2: memref<1x128x128xbf16, #tpu.memory_space<vmem>>, %arg3: memref<1x8x128xbf16, #tpu.memory_space<vmem>>, %arg4: memref<4x128x128xbf16, #tpu.memory_space<vmem>>, %arg5: memref<8x128xf32, #tpu.memory_space<vmem>>, %arg6: memref<1x8x128xf32, #tpu.memory_space<vmem>>) attributes {dimension_semantics = [#tpu.dimension_semantics<parallel>], iteration_bounds = array<i64: 1>, scalar_prefetch = 0 : i64, scratch_operands = 0 : i64, tpu.core_type = #tpu.core_type<tc>, window_params = [{transform_indices = @transform_0, window_bounds = array<i64: 1, 128, 128>}, {transform_indices = @transform_1, window_bounds = array<i64: 1, 128, 128>}, {transform_indices = @transform_2, window_bounds = array<i64: 1, 8, 128>}, {pipeline_mode = #tpu.pipeline_mode<synchronous>, transform_indices = @transform_3, window_bounds = array<i64: 4, 128, 128>}, {pipeline_mode = #tpu.pipeline_mode<synchronous>, transform_indices = @transform_4, window_bounds = array<i64: 8, 128>}, {transform_indices = @transform_5, window_bounds = array<i64: 1, 8, 128>}]} {
    %c0 = arith.constant 0 : index
    %c0_0 = arith.constant 0 : index
    %c0_1 = arith.constant 0 : index
    %0 = vector.load %arg1[%c0, %c0_0, %c0_1] : memref<1x128x128xbf16, #tpu.memory_space<vmem>>, vector<1x128x128xbf16>
    %1 = vector.shape_cast %0 : vector<1x128x128xbf16> to vector<128x128xbf16>
    %c0_2 = arith.constant 0 : index
    %c0_3 = arith.constant 0 : index
    %c0_4 = arith.constant 0 : index
    %2 = vector.load %arg2[%c0_2, %c0_3, %c0_4] : memref<1x128x128xbf16, #tpu.memory_space<vmem>>, vector<1x128x128xbf16>
    %3 = vector.shape_cast %2 : vector<1x128x128xbf16> to vector<128x128xbf16>
    %c0_5 = arith.constant 0 : index
    %c0_6 = arith.constant 0 : index
    %c0_7 = arith.constant 0 : index
    %4 = vector.load %arg4[%c0_5, %c0_6, %c0_7] : memref<4x128x128xbf16, #tpu.memory_space<vmem>>, vector<1x128x128xbf16>
    %5 = vector.shape_cast %4 : vector<1x128x128xbf16> to vector<128x128xbf16>
    %cst = arith.constant dense<0.000000e+00> : vector<128x128xf32>
    %6 = tpu.matmul %3, %5, %cst {dimension_numbers = #tpu.dot_dimension_numbers<[1], [0], [0], [1], [0, 0, 1, 1], [], []>} : vector<128x128xbf16>, vector<128x128xbf16>, vector<128x128xf32> -> vector<128x128xf32>
    %7 = arith.truncf %6 : vector<128x128xf32> to vector<128x128xbf16>
    %cst_8 = arith.constant dense<0.000000e+00> : vector<128x128xf32>
    %8 = tpu.matmul %1, %7, %cst_8 {dimension_numbers = #tpu.dot_dimension_numbers<[1], [0], [0], [1], [0, 0, 1, 1], [], []>} : vector<128x128xbf16>, vector<128x128xbf16>, vector<128x128xf32> -> vector<128x128xf32>
    %c0_9 = arith.constant 0 : index
    %c0_10 = arith.constant 0 : index
    %9 = vector.load %arg5[%c0_9, %c0_10] : memref<8x128xf32, #tpu.memory_space<vmem>>, vector<1x128xf32>
    %10 = vector.broadcast %9 : vector<1x128xf32> to vector<128x128xf32>
    %11 = arith.addf %8, %10 : vector<128x128xf32>
    %cst_11 = arith.constant 0.000000e+00 : f32
    %12 = vector.broadcast %cst_11 : f32 to vector<128x128xf32>
    %13 = arith.maximumf %11, %12 : vector<128x128xf32>
    %14 = arith.truncf %13 : vector<128x128xf32> to vector<128x128xbf16>
    %c1 = arith.constant 1 : index
    %c0_12 = arith.constant 0 : index
    %c0_13 = arith.constant 0 : index
    %15 = vector.load %arg4[%c1, %c0_12, %c0_13] : memref<4x128x128xbf16, #tpu.memory_space<vmem>>, vector<1x128x128xbf16>
    %16 = vector.shape_cast %15 : vector<1x128x128xbf16> to vector<128x128xbf16>
    %cst_14 = arith.constant dense<0.000000e+00> : vector<128x128xf32>
    %17 = tpu.matmul %14, %16, %cst_14 {dimension_numbers = #tpu.dot_dimension_numbers<[1], [0], [0], [1], [0, 0, 1, 1], [], []>} : vector<128x128xbf16>, vector<128x128xbf16>, vector<128x128xf32> -> vector<128x128xf32>
    %18 = arith.truncf %17 : vector<128x128xf32> to vector<128x128xbf16>
    %cst_15 = arith.constant dense<0.000000e+00> : vector<128x128xf32>
    %19 = tpu.matmul %1, %18, %cst_15 {dimension_numbers = #tpu.dot_dimension_numbers<[1], [0], [0], [1], [0, 0, 1, 1], [], []>} : vector<128x128xbf16>, vector<128x128xbf16>, vector<128x128xf32> -> vector<128x128xf32>
    %c1_16 = arith.constant 1 : index
    %c0_17 = arith.constant 0 : index
    %20 = vector.load %arg5[%c1_16, %c0_17] : memref<8x128xf32, #tpu.memory_space<vmem>>, vector<1x128xf32>
    %21 = vector.broadcast %20 : vector<1x128xf32> to vector<128x128xf32>
    %22 = arith.addf %19, %21 : vector<128x128xf32>
    %cst_18 = arith.constant 0.000000e+00 : f32
    %23 = vector.broadcast %cst_18 : f32 to vector<128x128xf32>
    %24 = arith.maximumf %22, %23 : vector<128x128xf32>
    %25 = arith.truncf %24 : vector<128x128xf32> to vector<128x128xbf16>
    %c2 = arith.constant 2 : index
    %c0_19 = arith.constant 0 : index
    %c0_20 = arith.constant 0 : index
    %26 = vector.load %arg4[%c2, %c0_19, %c0_20] : memref<4x128x128xbf16, #tpu.memory_space<vmem>>, vector<1x128x128xbf16>
    %27 = vector.shape_cast %26 : vector<1x128x128xbf16> to vector<128x128xbf16>
    %cst_21 = arith.constant dense<0.000000e+00> : vector<128x128xf32>
    %28 = tpu.matmul %25, %27, %cst_21 {dimension_numbers = #tpu.dot_dimension_numbers<[1], [0], [0], [1], [0, 0, 1, 1], [], []>} : vector<128x128xbf16>, vector<128x128xbf16>, vector<128x128xf32> -> vector<128x128xf32>
    %29 = arith.truncf %28 : vector<128x128xf32> to vector<128x128xbf16>
    %cst_22 = arith.constant dense<0.000000e+00> : vector<128x128xf32>
    %30 = tpu.matmul %1, %29, %cst_22 {dimension_numbers = #tpu.dot_dimension_numbers<[1], [0], [0], [1], [0, 0, 1, 1], [], []>} : vector<128x128xbf16>, vector<128x128xbf16>, vector<128x128xf32> -> vector<128x128xf32>
    %c2_23 = arith.constant 2 : index
    %c0_24 = arith.constant 0 : index
    %31 = vector.load %arg5[%c2_23, %c0_24] : memref<8x128xf32, #tpu.memory_space<vmem>>, vector<1x128xf32>
    %32 = vector.broadcast %31 : vector<1x128xf32> to vector<128x128xf32>
    %33 = arith.addf %30, %32 : vector<128x128xf32>
    %cst_25 = arith.constant 0.000000e+00 : f32
    %34 = vector.broadcast %cst_25 : f32 to vector<128x128xf32>
    %35 = arith.maximumf %33, %34 : vector<128x128xf32>
    %36 = arith.truncf %35 : vector<128x128xf32> to vector<128x128xbf16>
    %c0_26 = arith.constant 0 : index
    %c0_27 = arith.constant 0 : index
    %c0_28 = arith.constant 0 : index
    %37 = vector.load %arg3[%c0_26, %c0_27, %c0_28] : memref<1x8x128xbf16, #tpu.memory_space<vmem>>, vector<1x8x128xbf16>
    %38 = vector.shape_cast %37 : vector<1x8x128xbf16> to vector<8x128xbf16>
    %cst_29 = arith.constant dense<0.000000e+00> : vector<8x128xf32>
    %39 = tpu.matmul %38, %36, %cst_29 {dimension_numbers = #tpu.dot_dimension_numbers<[1], [0], [0], [1], [0, 0, 1, 1], [], []>} : vector<8x128xbf16>, vector<128x128xbf16>, vector<8x128xf32> -> vector<8x128xf32>
    %40 = arith.truncf %39 : vector<8x128xf32> to vector<8x128xbf16>
    %c3 = arith.constant 3 : index
    %c0_30 = arith.constant 0 : index
    %c0_31 = arith.constant 0 : index
    %41 = vector.load %arg4[%c3, %c0_30, %c0_31] : memref<4x128x128xbf16, #tpu.memory_space<vmem>>, vector<1x128x128xbf16>
    %42 = vector.shape_cast %41 : vector<1x128x128xbf16> to vector<128x128xbf16>
    %cst_32 = arith.constant dense<0.000000e+00> : vector<8x128xf32>
    %43 = tpu.matmul %40, %42, %cst_32 {dimension_numbers = #tpu.dot_dimension_numbers<[1], [0], [0], [1], [0, 0, 1, 1], [], []>} : vector<8x128xbf16>, vector<128x128xbf16>, vector<8x128xf32> -> vector<8x128xf32>
    %c3_33 = arith.constant 3 : index
    %c0_34 = arith.constant 0 : index
    %44 = vector.load %arg5[%c3_33, %c0_34] : memref<8x128xf32, #tpu.memory_space<vmem>>, vector<1x128xf32>
    %45 = vector.broadcast %44 : vector<1x128xf32> to vector<8x128xf32>
    %46 = arith.addf %43, %45 : vector<8x128xf32>
    %c0_35 = arith.constant 0 : index
    %c0_36 = arith.constant 0 : index
    %c0_37 = arith.constant 0 : index
    %47 = vector.load %arg6[%c0_35, %c0_36, %c0_37] : memref<1x8x128xf32, #tpu.memory_space<vmem>>, vector<1x8x128xf32>
    %48 = vector.shape_cast %47 : vector<1x8x128xf32> to vector<8x128xf32>
    %49 = vector.shape_cast %46 : vector<8x128xf32> to vector<1x8x128xf32>
    tpu.vector_store %arg6[%c0_35, %c0_36, %c0_37], %49 {strides = array<i32>} : memref<1x8x128xf32, #tpu.memory_space<vmem>>, vector<1x8x128xf32>,
    return
  }
  func.func @transform_0(%arg0: i32) -> (i32, i32, i32) {
    %c0_i32 = arith.constant 0 : i32
    %c0_i32_0 = arith.constant 0 : i32
    %c0_i32_1 = arith.constant 0 : i32
    return %arg0, %c0_i32, %c0_i32_0 : i32, i32, i32
  }
  func.func @transform_1(%arg0: i32) -> (i32, i32, i32) {
    %c0_i32 = arith.constant 0 : i32
    %c0_i32_0 = arith.constant 0 : i32
    %c0_i32_1 = arith.constant 0 : i32
    return %arg0, %c0_i32, %c0_i32_0 : i32, i32, i32
  }
  func.func @transform_2(%arg0: i32) -> (i32, i32, i32) {
    %c0_i32 = arith.constant 0 : i32
    %c0_i32_0 = arith.constant 0 : i32
    %c0_i32_1 = arith.constant 0 : i32
    return %arg0, %c0_i32, %c0_i32_0 : i32, i32, i32
  }
  func.func @transform_3(%arg0: i32) -> (i32, i32, i32) {
    %c0_i32 = arith.constant 0 : i32
    %c0_i32_0 = arith.constant 0 : i32
    %c0_i32_1 = arith.constant 0 : i32
    %c0_i32_2 = arith.constant 0 : i32
    return %c0_i32, %c0_i32_0, %c0_i32_1 : i32, i32, i32
  }
  func.func @transform_4(%arg0: i32) -> (i32, i32) {
    %c0_i32 = arith.constant 0 : i32
    %c0_i32_0 = arith.constant 0 : i32
    %c0_i32_1 = arith.constant 0 : i32
    return %c0_i32, %c0_i32_0 : i32, i32
  }
  func.func @transform_5(%arg0: i32) -> (i32, i32, i32) {
    %c0_i32 = arith.constant 0 : i32
    %c0_i32_0 = arith.constant 0 : i32
    %c0_i32_1 = arith.constant 0 : i32
    return %arg0, %c0_i32, %c0_i32_0 : i32, i32, i32
  }
}

</mosaic_0001>

<bundles_post_ra>
// kernel: tpu_custom_call.1
= control target key start
LH: loop header
LB: loop body
LE: loop exit
PB: predicated region body
PF: predicated region fallthrough
CT: control target
= control target key end

     0   :  { %10 = vsyncpa [#allocation3], 0  ;;  %s1970_s0 = inlined_call_operand.hbm [shape: bf16[1,128,128], index: 0, kind: input, shape index: {}]   ;;  %s1971_s1 = inlined_call_operand.hbm [shape: bf16[1,128,128], index: 1, kind: input, shape index: {}]   ;;  %s1972_s2 = inlined_call_operand.vmem [shape: bf16[1,8,128], index: 2, kind: input, shape index: {}]   ;;  %s1973_s3 = inlined_call_operand.hbm [shape: bf16[4,128,128], index: 3, kind: input, shape index: {}]   ;;  %s1974_s4 = inlined_call_operand.vmem [shape: f32[8,128], index: 4, kind: input, shape index: {}]   ;;  %s1975_s5 = inlined_call_operand.hbm [shape: f32[1,8,128], index: 5, kind: output, shape index: {}]  }
   0x1   :  { %11 = vsyncpa [#allocation6], 0 }
   0x2   :  { %12 = vsyncpa [#allocation4], 0  ;;  %s1795_s18 = smov [#allocation5]   ;;  %s1796_s20 = smov [#allocation2]  }
   0x3   :  { %s30_s19 = sshll.u32 %s1795_s18, 4  ;;  %s18_s21 = sshll.u32 %s1796_s20, 4  ;;  %s31_s19 = int_to_ptr.vmem [resolvable:$true] %s30_s19  ;;  %s1833_s21 = int_to_ptr.vmem [resolvable:$true] %s18_s21 }
   0x4   :  { %s1701_s24 = scalar_lea.hbm %s1971_s1, 1024 }
   0x5   :  { %p1702_p0 = scmp.ne.s32.totalorder %s1971_s1, %s1701_s24  ;;  %p1705_p1 = scmp.lt.u32.totalorder %s1701_s24, %s1971_s1 }
   0x7   :  { %p1707_p2 = pnand %p1705_p1, %p1702_p0 }
   0x9   :  { %1710 = shalt.err (!%p1707_p2)
}
   0xa   :  { %s1711_s29 = scalar_lea.vmem %s31_s19, 1024  ;;  %p1716_p4 = scmp.lt.s32.totalorder %s31_s19, %s31_s19 }
   0xb   :  { %p1712_p3 = scmp.ne.s32.totalorder %s31_s19, %s1711_s29  ;;  %p1717_p5 = scmp.lt.s32.totalorder %s1711_s29, %s1711_s29 }
   0xd   :  { %p1718_p6 = por %p1717_p5, %p1716_p4 }
   0xf   :  { %p1719_p7 = pnand %p1718_p6, %p1712_p3 }
  0x11   :  { %1722 = shalt.err (!%p1719_p7)
}
  0x12   :  { %s1797_s30 = smov 64   ;;  %s1798_s6 = smov 4  }
  0x13   :  { %36 = dma.hbm_to_vmem [thread:$0]  %s1971_s1, 1024, %s31_s19, [#allocation6], %s1797_s30, %s1797_s30, %s1798_s6  }
  0x14   :  { %s1723_s11 = scalar_lea.hbm %s1970_s0, 1024 }
  0x15   :  { %p1724_p8 = scmp.ne.s32.totalorder %s1970_s0, %s1723_s11  ;;  %p1727_p9 = scmp.lt.u32.totalorder %s1723_s11, %s1970_s0 }
  0x17   :  { %p1729_p10 = pnand %p1727_p9, %p1724_p8 }
  0x19   :  { %1732 = shalt.err (!%p1729_p10)
}
  0x1a   :  { %s1733_s16 = scalar_lea.vmem %s1833_s21, 1024  ;;  %p1738_p12 = scmp.lt.s32.totalorder %s1833_s21, %s1833_s21 }
  0x1b   :  { %p1734_p11 = scmp.ne.s32.totalorder %s1833_s21, %s1733_s16  ;;  %p1739_p13 = scmp.lt.s32.totalorder %s1733_s16, %s1733_s16 }
  0x1d   :  { %p1740_p0 = por %p1739_p13, %p1738_p12 }
  0x1f   :  { %p1741_p1 = pnand %p1740_p0, %p1734_p11 }
  0x21   :  { %1744 = shalt.err (!%p1741_p1)
}
  0x22   :  { %24 = dma.hbm_to_vmem [thread:$0]  %s1970_s0, 1024, %s1833_s21, [#allocation3], %s1797_s30, %s1797_s30, %s1798_s6  }
  0x23   :  { %s1799_s18 = smov [#allocation7]   ;;  %s1745_s23 = scalar_lea.hbm %s1973_s3, 4096 }
  0x24   :  { %s44_s19 = sshll.u32 %s1799_s18, 4  ;;  %p1746_p2 = scmp.ne.s32.totalorder %s1973_s3, %s1745_s23  ;;  %s45_s19 = int_to_ptr.vmem [resolvable:$true] %s44_s19 }
  0x25   :  { %p1749_p3 = scmp.lt.u32.totalorder %s1745_s23, %s1973_s3 }
  0x27   :  { %p1751_p4 = pnand %p1749_p3, %p1746_p2 }
  0x29   :  { %1754 = shalt.err (!%p1751_p4)
}
  0x2a   :  { %s1755_s28 = scalar_lea.vmem %s45_s19, 4096  ;;  %p1760_p6 = scmp.lt.s32.totalorder %s45_s19, %s45_s19 }
  0x2b   :  { %p1756_p5 = scmp.ne.s32.totalorder %s45_s19, %s1755_s28  ;;  %p1761_p7 = scmp.lt.s32.totalorder %s1755_s28, %s1755_s28 }
  0x2d   :  { %p1762_p8 = por %p1761_p7, %p1760_p6 }
  0x2f   :  { %p1763_p9 = pnand %p1762_p8, %p1756_p5 }
  0x31   :  { %1766 = shalt.err (!%p1763_p9)
}
  0x32   :  { %50 = dma.hbm_to_vmem [thread:$0]  %s1973_s3, 4096, %s45_s19, [#allocation6], %s1797_s30, %s1797_s30, %s1798_s6  }
  0x33   :  { %1789 = dma.done.wait [#allocation3], 1024  }
  0x34   :  { %1790 = vsyncadd [#allocation3], 4294966272 }
  0x35   :  { %1791 = dma.done.wait [#allocation6], 5120  }
  0x36   :  { %1792 = vsyncadd [#allocation6], 4294962176  ;;  %v1653_v0 = vld [vmem:[#allocation7] sm:$0xff]   ;;  %v1654_v1 = vld [vmem:[#allocation7 + $0x8] sm:$0xff]   ;;  %vm1801_vm0 = vmmov 0   ;;  %s1802_s13 = smov [#allocation8]  }
  0x37   :  { %1413 = vmatprep.subr.bf16.mxu0 %v1653_v0  ;;  %v1655_v2 = vld [vmem:[#allocation7 + $0x10] sm:$0xff]   ;;  %v1656_v3 = vld [vmem:[#allocation7 + $0x18] sm:$0xff]   ;;  %v1661_v4 = vld [vmem:[#allocation5] sm:$0xff]   ;;  %s1237_s14 = sshll.u32 %s1802_s13, 4  ;;  %s1238_s14 = int_to_ptr.vmem [resolvable:$true] %s1237_s14 }
  0x38   :  { %1414 = vmatpush3.bf16.msra.mxu0 %v1653_v0  ;;  %1429 = vmatprep.mubr.bf16.mxu0 %v1661_v4  ;;  %v1657_v5 = vld [vmem:[#allocation7 + $0x20] sm:$0xff]   ;;  %v1658_v6 = vld [vmem:[#allocation7 + $0x28] sm:$0xff]   ;;  %v1659_v7 = vld [vmem:[#allocation7 + $0x30] sm:$0xff]   ;;  %p1772_p11 = scmp.lt.s32.totalorder %s1238_s14, %s1238_s14 }
  0x39   :  { %1415 = vmatprep.subr.bf16.mxu0 %v1654_v1  ;;  %v1660_v8 = vld [vmem:[#allocation7 + $0x38] sm:$0xff]   ;;  %v1662_v9 = vld [vmem:[#allocation5 + $0x8] sm:$0xff]   ;;  %v1663_v10 = vld [vmem:[#allocation5 + $0x10] sm:$0xff]  }
  0x3a   :  { %v1664_v11 = vld [vmem:[#allocation5 + $0x18] sm:$0xff]   ;;  %v1665_v12 = vld [vmem:[#allocation5 + $0x20] sm:$0xff]   ;;  %v1666_v13 = vld [vmem:[#allocation5 + $0x28] sm:$0xff]  }
  0x3b   :  { %v1667_v14 = vld [vmem:[#allocation5 + $0x30] sm:$0xff]   ;;  %v1668_v15 = vld [vmem:[#allocation5 + $0x38] sm:$0xff]   ;;  %v1885_v16 = vld [vmem:[#allocation2] sm:$0xff]  }
  0x3c   :  { %1416 = vmatpush3.bf16.msra.mxu0 %v1654_v1  ;;  %1461 = vmatprep.mubr.bf16.mxu1 %v1885_v16  ;;  %v1677_v17 = vld [vmem:[#allocation7 + $0x40] sm:$0xff]   ;;  %v1678_v18 = vld [vmem:[#allocation7 + $0x48] sm:$0xff]   ;;  %v1679_v19 = vld [vmem:[#allocation7 + $0x50] sm:$0xff]  }
  0x3d   :  { %1417 = vmatprep.subr.bf16.mxu0 %v1655_v2  ;;  %v1680_v20 = vld [vmem:[#allocation7 + $0x58] sm:$0xff]   ;;  %v1681_v21 = vld [vmem:[#allocation7 + $0x60] sm:$0xff]   ;;  %v1682_v22 = vld [vmem:[#allocation7 + $0x68] sm:$0xff]  }
  0x3e   :  { %v1888_v47 = vld [vmem:[#allocation2 + $0x8] sm:$0xff]   ;;  %v1890_v48 = vld [vmem:[#allocation2 + $0x10] sm:$0xff]   ;;  %v1894_v49 = vld [vmem:[#allocation2 + $0x18] sm:$0xff]  }
  0x3f   :  { %v1896_v50 = vld [vmem:[#allocation2 + $0x20] sm:$0xff]   ;;  %v1900_v51 = vld [vmem:[#allocation2 + $0x28] sm:$0xff]   ;;  %v1902_v52 = vld [vmem:[#allocation2 + $0x30] sm:$0xff]  }
  0x40   :  { %1418 = vmatpush3.bf16.msra.mxu0 %v1655_v2  ;;  %v1906_v53 = vld [vmem:[#allocation2 + $0x38] sm:$0xff]   ;;  %v1683_v54 = vld [vmem:[#allocation7 + $0x70] sm:$0xff]   ;;  %v1263_v56 = vld [vmem:[%s1974_s4] ss:$0 sm:$0xff] }
  0x41   :  { %1419 = vmatprep.subr.bf16.mxu0 %v1656_v3  ;;  %v1684_v55 = vld [vmem:[#allocation7 + $0x78] sm:$0xff]  }
  0x44   :  { %1420 = vmatpush3.bf16.msra.mxu0 %v1656_v3 }
  0x45   :  { %1421 = vmatprep.subr.bf16.mxu0 %v1657_v5 }
  0x48   :  { %1422 = vmatpush3.bf16.msra.mxu0 %v1657_v5 }
  0x49   :  { %1423 = vmatprep.subr.bf16.mxu0 %v1658_v6 }
  0x4c   :  { %1424 = vmatpush3.bf16.msra.mxu0 %v1658_v6 }
  0x4d   :  { %1425 = vmatprep.subr.bf16.mxu0 %v1659_v7 }
  0x50   :  { %1426 = vmatpush3.bf16.msra.mxu0 %v1659_v7 }
  0x51   :  { %1427 = vmatprep.subr.bf16.mxu0 %v1660_v8 }
  0x54   :  { %1428 = vmatpush3.bf16.msra.mxu0 %v1660_v8 }
  0x55   :  { %1477 = vmatprep.subr.bf16.mxu0 %v1677_v17 }
  0x57   :  { %1430 = vmatmul.mubr.bf16.vlgmr.msra.gmra.mrb[0].mxu0 %v1662_v9 }
  0x58   :  { %1433 = vmatprep.mubr.bf16.mxu0 %v1663_v10  ;;  %1478 = vmatpush3.bf16.msra.mxu0 %v1677_v17 }
  0x59   :  { %1479 = vmatprep.subr.bf16.mxu0 %v1678_v18 }
  0x5c   :  { %1480 = vmatpush3.bf16.msra.mxu0 %v1678_v18 }
  0x5d   :  { %1481 = vmatprep.subr.bf16.mxu0 %v1679_v19 }
  0x5f   :  { %1434 = vmatmul.mubr.bf16.gmra.mrb[4].mxu0 %v1664_v11 }
  0x60   :  { %1437 = vmatprep.mubr.bf16.mxu0 %v1665_v12  ;;  %1482 = vmatpush3.bf16.msra.mxu0 %v1679_v19 }
  0x61   :  { %1483 = vmatprep.subr.bf16.mxu0 %v1680_v20 }
  0x64   :  { %1484 = vmatpush3.bf16.msra.mxu0 %v1680_v20 }
  0x65   :  { %1485 = vmatprep.subr.bf16.mxu0 %v1681_v21 }
  0x67   :  { %1438 = vmatmul.mubr.bf16.gmra.mrb[8].mxu0 %v1666_v13 }
  0x68   :  { %1441 = vmatprep.mubr.bf16.mxu0 %v1667_v14  ;;  %1486 = vmatpush3.bf16.msra.mxu0 %v1681_v21 }
  0x69   :  { %1487 = vmatprep.subr.bf16.mxu0 %v1682_v22 }
  0x6c   :  { %1488 = vmatpush3.bf16.msra.mxu0 %v1682_v22 }
  0x6d   :  { %1489 = vmatprep.subr.bf16.mxu0 %v1683_v54 }
  0x6f   :  { %1442 = vmatmul.mubr.bf16.gmra.mrb[12].mxu0 %v1668_v15 }
  0x70   :  { %1490 = vmatpush3.bf16.msra.mxu0 %v1683_v54 }
  0x71   :  { %1491 = vmatprep.subr.bf16.mxu0 %v1684_v55 }
  0x74   :  { %1492 = vmatpush3.bf16.msra.mxu0 %v1684_v55 }
 0x12a   :  { %v1431_v23 = vpop.f32.mrb[0].mxu0 }
 0x12b   :  { %v241_v24 = vpop.f32.mrb[1].mxu0 }
 0x12c   :  { %v1432_v25 = vpop.f32.mrb[2].mxu0 }
 0x12d   :  { %v305_v26 = vpack.c.bf16 %v1432_v25, %v1431_v23  ;;  %v244_v27 = vpop.f32.mrb[3].mxu0 }
 0x12e   :  { %v304_v28 = vpack.c.bf16 %v244_v27, %v241_v24 }
 0x130   :  { %1445 = vmatprep.subr.bf16.mxu1 %v304_v28 }
 0x131   :  { %1446 = vmatpush3.bf16.msra.mxu1 %v304_v28 }
 0x132   :  { %v1435_v29 = vpop.f32.mrb[4].mxu0  ;;  %1447 = vmatprep.subr.bf16.mxu1 %v305_v26 }
 0x133   :  { %v257_v30 = vpop.f32.mrb[5].mxu0 }
 0x134   :  { %v1436_v31 = vpop.f32.mrb[6].mxu0 }
 0x135   :  { %v307_v32 = vpack.c.bf16 %v1436_v31, %v1435_v29  ;;  %v260_v33 = vpop.f32.mrb[7].mxu0  ;;  %1448 = vmatpush3.bf16.msra.mxu1 %v305_v26 }
 0x136   :  { %v306_v34 = vpack.c.bf16 %v260_v33, %v257_v30 }
 0x138   :  { %1449 = vmatprep.subr.bf16.mxu1 %v306_v34 }
 0x139   :  { %1450 = vmatpush3.bf16.msra.mxu1 %v306_v34 }
 0x13a   :  { %v1439_v35 = vpop.f32.mrb[8].mxu0  ;;  %1451 = vmatprep.subr.bf16.mxu1 %v307_v32 }
 0x13b   :  { %v273_v36 = vpop.f32.mrb[9].mxu0 }
 0x13c   :  { %v1440_v37 = vpop.f32.mrb[10].mxu0 }
 0x13d   :  { %v309_v38 = vpack.c.bf16 %v1440_v37, %v1439_v35  ;;  %v276_v39 = vpop.f32.mrb[11].mxu0  ;;  %1452 = vmatpush3.bf16.msra.mxu1 %v307_v32 }
 0x13e   :  { %v308_v40 = vpack.c.bf16 %v276_v39, %v273_v36 }
 0x140   :  { %1453 = vmatprep.subr.bf16.mxu1 %v308_v40 }
 0x141   :  { %1454 = vmatpush3.bf16.msra.mxu1 %v308_v40 }
 0x142   :  { %v1443_v41 = vpop.f32.mrb[12].mxu0  ;;  %1455 = vmatprep.subr.bf16.mxu1 %v309_v38 }
 0x143   :  { %v289_v42 = vpop.f32.mrb[13].mxu0 }
 0x144   :  { %v1444_v43 = vpop.f32.mrb[14].mxu0 }
 0x145   :  { %v311_v44 = vpack.c.bf16 %v1444_v43, %v1443_v41  ;;  %v292_v45 = vpop.f32.mrb[15].mxu0  ;;  %1456 = vmatpush3.bf16.msra.mxu1 %v309_v38 }
 0x146   :  { %v310_v46 = vpack.c.bf16 %v292_v45, %v289_v42 }
 0x148   :  { %1457 = vmatprep.subr.bf16.mxu1 %v310_v46 }
 0x149   :  { %1458 = vmatpush3.bf16.msra.mxu1 %v310_v46 }
 0x14a   :  { %1459 = vmatprep.subr.bf16.mxu1 %v311_v44 }
 0x14d   :  { %1460 = vmatpush3.bf16.msra.mxu1 %v311_v44 }
 0x150   :  { %1462 = vmatmul.mubr.bf16.vlgmr.msra.gmra.mrb[0].mxu1 %v1888_v47 }
 0x151   :  { %1465 = vmatprep.mubr.bf16.mxu1 %v1890_v48 }
 0x158   :  { %1466 = vmatmul.mubr.bf16.gmra.mrb[4].mxu1 %v1894_v49 }
 0x159   :  { %1469 = vmatprep.mubr.bf16.mxu1 %v1896_v50 }
 0x160   :  { %1470 = vmatmul.mubr.bf16.gmra.mrb[8].mxu1 %v1900_v51 }
 0x161   :  { %1473 = vmatprep.mubr.bf16.mxu1 %v1902_v52 }
 0x168   :  { %1474 = vmatmul.mubr.bf16.gmra.mrb[12].mxu1 %v1906_v53 }
 0x169   :  { %1525 = vmatprep.mubr.bf16.mxu1 %v1885_v16 }
 0x223   :  { %v1463_v57 = vpop.f32.mrb[0].mxu1 }
 0x224   :  { %v408_v58 = vadd.f32 %v1463_v57, %v1263_v56  ;;  %v399_v59 = vpop.f32.mrb[1].mxu1 }
 0x225   :  { %v400_v60 = vadd.f32 %v1263_v56, %v399_v59  ;;  %v1464_v61 = vpop.f32.mrb[2].mxu1  ;;  %v1686_v59 = vld [vmem:[#allocation7 + $0x88] sm:$0xff]  }
 0x226   :  { %v411_v62 = vadd.f32 %v1464_v61, %v1263_v56  ;;  %v402_v63 = vpop.f32.mrb[3].mxu1  ;;  %v464_v1 = vmax.f32 %v408_v58, 0.0  ;;  %v1685_v58 = vld [vmem:[#allocation7 + $0x80] sm:$0xff]   ;;  %v1688_v61 = vld [vmem:[#allocation7 + $0x98] sm:$0xff]  }
 0x227   :  { %v403_v0 = vadd.f32 %v1263_v56, %v402_v63  ;;  %v462_v3 = vmax.f32 %v400_v60, 0.0  ;;  %1541 = vmatprep.subr.bf16.mxu0 %v1685_v58  ;;  %v1687_v60 = vld [vmem:[#allocation7 + $0x90] sm:$0xff]  }
 0x228   :  { %v465_v2 = vmax.f32 %v411_v62, 0.0  ;;  %v1690_v62 = vld [vmem:[#allocation7 + $0xa8] sm:$0xff]  }
 0x229   :  { %v463_v4 = vmax.f32 %v403_v0, 0.0 }
 0x22a   :  { %v479_v5 = vpack.c.bf16 %v465_v2, %v464_v1 }
 0x22b   :  { %v478_v6 = vpack.c.bf16 %v463_v4, %v462_v3  ;;  %v1467_v7 = vpop.f32.mrb[4].mxu1 }
 0x22c   :  { %v424_v8 = vadd.f32 %v1467_v7, %v1263_v56  ;;  %v415_v9 = vpop.f32.mrb[5].mxu1 }
 0x22d   :  { %v416_v10 = vadd.f32 %v1263_v56, %v415_v9  ;;  %v1468_v11 = vpop.f32.mrb[6].mxu1  ;;  %1493 = vmatprep.mubr.bf16.mxu0 %v478_v6 }
 0x22e   :  { %v427_v12 = vadd.f32 %v1468_v11, %v1263_v56  ;;  %v418_v13 = vpop.f32.mrb[7].mxu1  ;;  %1494 = vmatmul.mubr.bf16.vlgmr.msra.gmra.mrb[16].mxu0 %v479_v5  ;;  %v468_v15 = vmax.f32 %v424_v8, 0.0 }
 0x22f   :  { %v419_v14 = vadd.f32 %v1263_v56, %v418_v13  ;;  %v466_v18 = vmax.f32 %v416_v10, 0.0  ;;  %1542 = vmatpush3.bf16.msra.mxu0 %v1685_v58 }
 0x230   :  { %v469_v17 = vmax.f32 %v427_v12, 0.0  ;;  %1543 = vmatprep.subr.bf16.mxu0 %v1686_v59 }
 0x231   :  { %v467_v19 = vmax.f32 %v419_v14, 0.0 }
 0x232   :  { %v481_v20 = vpack.c.bf16 %v469_v17, %v468_v15 }
 0x233   :  { %v480_v21 = vpack.c.bf16 %v467_v19, %v466_v18  ;;  %v1471_v22 = vpop.f32.mrb[8].mxu1  ;;  %1544 = vmatpush3.bf16.msra.mxu0 %v1686_v59 }
 0x234   :  { %v440_v23 = vadd.f32 %v1471_v22, %v1263_v56  ;;  %v431_v24 = vpop.f32.mrb[9].mxu1  ;;  %1545 = vmatprep.subr.bf16.mxu0 %v1687_v60 }
 0x235   :  { %v432_v25 = vadd.f32 %v1263_v56, %v431_v24  ;;  %v1472_v26 = vpop.f32.mrb[10].mxu1  ;;  %1497 = vmatprep.mubr.bf16.mxu0 %v480_v21  ;;  %v1691_v24 = vld [vmem:[#allocation7 + $0xb0] sm:$0xff]  }
 0x236   :  { %v443_v27 = vadd.f32 %v1472_v26, %v1263_v56  ;;  %v434_v28 = vpop.f32.mrb[11].mxu1  ;;  %1498 = vmatmul.mubr.bf16.gmra.mrb[20].mxu0 %v481_v20  ;;  %v472_v30 = vmax.f32 %v440_v23, 0.0  ;;  %v1280_v26 = vld [vmem:[%s1974_s4 + $0x1] ss:$0 sm:$0xff] }
 0x237   :  { %v435_v29 = vadd.f32 %v1263_v56, %v434_v28  ;;  %v470_v32 = vmax.f32 %v432_v25, 0.0  ;;  %1546 = vmatpush3.bf16.msra.mxu0 %v1687_v60  ;;  %v1692_v25 = vld [vmem:[#allocation7 + $0xb8] sm:$0xff]  }
 0x238   :  { %v473_v31 = vmax.f32 %v443_v27, 0.0  ;;  %1547 = vmatprep.subr.bf16.mxu0 %v1688_v61 }
 0x239   :  { %v471_v33 = vmax.f32 %v435_v29, 0.0 }
 0x23a   :  { %v483_v34 = vpack.c.bf16 %v473_v31, %v472_v30 }
 0x23b   :  { %v482_v35 = vpack.c.bf16 %v471_v33, %v470_v32  ;;  %v1475_v36 = vpop.f32.mrb[12].mxu1  ;;  %1548 = vmatpush3.bf16.msra.mxu0 %v1688_v61 }
 0x23c   :  { %v456_v37 = vadd.f32 %v1475_v36, %v1263_v56  ;;  %v447_v38 = vpop.f32.mrb[13].mxu1 }
 0x23d   :  { %v448_v39 = vadd.f32 %v1263_v56, %v447_v38  ;;  %v1476_v40 = vpop.f32.mrb[14].mxu1  ;;  %1501 = vmatprep.mubr.bf16.mxu0 %v482_v35 }
 0x23e   :  { %v459_v41 = vadd.f32 %v1476_v40, %v1263_v56  ;;  %v450_v42 = vpop.f32.mrb[15].mxu1  ;;  %1502 = vmatmul.mubr.bf16.gmra.mrb[24].mxu0 %v483_v34  ;;  %v476_v44 = vmax.f32 %v456_v37, 0.0 }
 0x23f   :  { %v451_v43 = vadd.f32 %v1263_v56, %v450_v42  ;;  %v474_v46 = vmax.f32 %v448_v39, 0.0  ;;  %v1689_v56 = vld [vmem:[#allocation7 + $0xa0] sm:$0xff]  }
 0x240   :  { %v477_v45 = vmax.f32 %v459_v41, 0.0  ;;  %1549 = vmatprep.subr.bf16.mxu0 %v1689_v56 }
 0x241   :  { %v475_v54 = vmax.f32 %v451_v43, 0.0  ;;  %1550 = vmatpush3.bf16.msra.mxu0 %v1689_v56 }
 0x242   :  { %v485_v55 = vpack.c.bf16 %v477_v45, %v476_v44  ;;  %1551 = vmatprep.subr.bf16.mxu0 %v1690_v62 }
 0x243   :  { %v484_v57 = vpack.c.bf16 %v475_v54, %v474_v46 }
 0x245   :  { %1505 = vmatprep.mubr.bf16.mxu0 %v484_v57  ;;  %1552 = vmatpush3.bf16.msra.mxu0 %v1690_v62 }
 0x246   :  { %1506 = vmatmul.mubr.bf16.gmra.mrb[28].mxu0 %v485_v55  ;;  %1553 = vmatprep.subr.bf16.mxu0 %v1691_v24 }
 0x249   :  { %1554 = vmatpush3.bf16.msra.mxu0 %v1691_v24 }
 0x24a   :  { %1555 = vmatprep.subr.bf16.mxu0 %v1692_v25 }
 0x24d   :  { %1556 = vmatpush3.bf16.msra.mxu0 %v1692_v25 }
 0x301   :  { %v1495_v63 = vpop.f32.mrb[16].mxu0 }
 0x302   :  { %v585_v0 = vpop.f32.mrb[17].mxu0 }
 0x303   :  { %v1496_v1 = vpop.f32.mrb[18].mxu0 }
 0x304   :  { %v649_v2 = vpack.c.bf16 %v1496_v1, %v1495_v63  ;;  %v588_v3 = vpop.f32.mrb[19].mxu0 }
 0x305   :  { %v648_v4 = vpack.c.bf16 %v588_v3, %v585_v0 }
 0x307   :  { %1509 = vmatprep.subr.bf16.mxu1 %v648_v4 }
 0x308   :  { %1510 = vmatpush3.bf16.msra.mxu1 %v648_v4 }
 0x309   :  { %v1499_v5 = vpop.f32.mrb[20].mxu0  ;;  %1511 = vmatprep.subr.bf16.mxu1 %v649_v2 }
 0x30a   :  { %v601_v6 = vpop.f32.mrb[21].mxu0 }
 0x30b   :  { %v1500_v7 = vpop.f32.mrb[22].mxu0 }
 0x30c   :  { %v651_v8 = vpack.c.bf16 %v1500_v7, %v1499_v5  ;;  %v604_v9 = vpop.f32.mrb[23].mxu0  ;;  %1512 = vmatpush3.bf16.msra.mxu1 %v649_v2 }
 0x30d   :  { %v650_v10 = vpack.c.bf16 %v604_v9, %v601_v6 }
 0x30f   :  { %1513 = vmatprep.subr.bf16.mxu1 %v650_v10 }
 0x310   :  { %1514 = vmatpush3.bf16.msra.mxu1 %v650_v10 }
 0x311   :  { %v1503_v11 = vpop.f32.mrb[24].mxu0  ;;  %1515 = vmatprep.subr.bf16.mxu1 %v651_v8 }
 0x312   :  { %v617_v12 = vpop.f32.mrb[25].mxu0 }
 0x313   :  { %v1504_v13 = vpop.f32.mrb[26].mxu0 }
 0x314   :  { %v653_v14 = vpack.c.bf16 %v1504_v13, %v1503_v11  ;;  %v620_v15 = vpop.f32.mrb[27].mxu0  ;;  %1516 = vmatpush3.bf16.msra.mxu1 %v651_v8 }
 0x315   :  { %v652_v17 = vpack.c.bf16 %v620_v15, %v617_v12 }
 0x317   :  { %1517 = vmatprep.subr.bf16.mxu1 %v652_v17 }
 0x318   :  { %1518 = vmatpush3.bf16.msra.mxu1 %v652_v17 }
 0x319   :  { %v1507_v18 = vpop.f32.mrb[28].mxu0  ;;  %1519 = vmatprep.subr.bf16.mxu1 %v653_v14 }
 0x31a   :  { %v633_v19 = vpop.f32.mrb[29].mxu0 }
 0x31b   :  { %v1508_v20 = vpop.f32.mrb[30].mxu0 }
 0x31c   :  { %v655_v21 = vpack.c.bf16 %v1508_v20, %v1507_v18  ;;  %v636_v22 = vpop.f32.mrb[31].mxu0  ;;  %1520 = vmatpush3.bf16.msra.mxu1 %v653_v14 }
 0x31d   :  { %v654_v23 = vpack.c.bf16 %v636_v22, %v633_v19 }
 0x31f   :  { %1521 = vmatprep.subr.bf16.mxu1 %v654_v23 }
 0x320   :  { %1522 = vmatpush3.bf16.msra.mxu1 %v654_v23 }
 0x321   :  { %1523 = vmatprep.subr.bf16.mxu1 %v655_v21 }
 0x324   :  { %1524 = vmatpush3.bf16.msra.mxu1 %v655_v21 }
 0x327   :  { %1526 = vmatmul.mubr.bf16.vlgmr.msra.gmra.mrb[16].mxu1 %v1888_v47 }
 0x328   :  { %1529 = vmatprep.mubr.bf16.mxu1 %v1890_v48 }
 0x32f   :  { %1530 = vmatmul.mubr.bf16.gmra.mrb[20].mxu1 %v1894_v49 }
 0x330   :  { %1533 = vmatprep.mubr.bf16.mxu1 %v1896_v50 }
 0x337   :  { %1534 = vmatmul.mubr.bf16.gmra.mrb[24].mxu1 %v1900_v51 }
 0x338   :  { %1537 = vmatprep.mubr.bf16.mxu1 %v1902_v52 }
 0x33f   :  { %1538 = vmatmul.mubr.bf16.gmra.mrb[28].mxu1 %v1906_v53 }
 0x340   :  { %1589 = vmatprep.mubr.bf16.mxu1 %v1885_v16 }
 0x3fa   :  { %v1527_v27 = vpop.f32.mrb[16].mxu1 }
 0x3fb   :  { %v704_v28 = vadd.f32 %v1527_v27, %v1280_v26  ;;  %v695_v29 = vpop.f32.mrb[17].mxu1 }
 0x3fc   :  { %v696_v30 = vadd.f32 %v1280_v26, %v695_v29  ;;  %v1528_v31 = vpop.f32.mrb[18].mxu1 }
 0x3fd   :  { %v707_v32 = vadd.f32 %v1528_v31, %v1280_v26  ;;  %v698_v33 = vpop.f32.mrb[19].mxu1  ;;  %v760_v35 = vmax.f32 %v704_v28, 0.0 }
 0x3fe   :  { %v699_v34 = vadd.f32 %v1280_v26, %v698_v33  ;;  %v758_v36 = vmax.f32 %v696_v30, 0.0 }
 0x3ff   :  { %v761_v16 = vmax.f32 %v707_v32, 0.0 }
 0x400   :  { %v759_v37 = vmax.f32 %v699_v34, 0.0 }
 0x401   :  { %v775_v38 = vpack.c.bf16 %v761_v16, %v760_v35 }
 0x402   :  { %v774_v39 = vpack.c.bf16 %v759_v37, %v758_v36  ;;  %v1531_v40 = vpop.f32.mrb[20].mxu1 }
 0x403   :  { %v720_v41 = vadd.f32 %v1531_v40, %v1280_v26  ;;  %v711_v42 = vpop.f32.mrb[21].mxu1 }
 0x404   :  { %v712_v43 = vadd.f32 %v1280_v26, %v711_v42  ;;  %v1532_v44 = vpop.f32.mrb[22].mxu1  ;;  %1557 = vmatprep.mubr.bf16.mxu0 %v774_v39 }
 0x405   :  { %v723_v45 = vadd.f32 %v1532_v44, %v1280_v26  ;;  %v714_v46 = vpop.f32.mrb[23].mxu1  ;;  %1558 = vmatmul.mubr.bf16.vlgmr.msra.gmra.mrb[32].mxu0 %v775_v38  ;;  %v764_v55 = vmax.f32 %v720_v41, 0.0 }
 0x406   :  { %v715_v54 = vadd.f32 %v1280_v26, %v714_v46  ;;  %v762_v58 = vmax.f32 %v712_v43, 0.0 }
 0x407   :  { %v765_v57 = vmax.f32 %v723_v45, 0.0 }
 0x408   :  { %v763_v59 = vmax.f32 %v715_v54, 0.0 }
 0x409   :  { %v777_v60 = vpack.c.bf16 %v765_v57, %v764_v55  ;;  %v1800_v57 = vmov 0.0  }
 0x40a   :  { %v776_v61 = vpack.c.bf16 %v763_v59, %v762_v58  ;;  %v1535_v56 = vpop.f32.mrb[24].mxu1  ;;  %1605 = vmatprep.subr.bf16.mxu0 %v1800_v57  ;;  %v1289_v58 = vld [vmem:[%s1974_s4 + $0x2] ss:$0 sm:$0xff] }
 0x40b   :  { %v736_v62 = vadd.f32 %v1535_v56, %v1280_v26  ;;  %v727_v63 = vpop.f32.mrb[25].mxu1 }
 0x40c   :  { %v728_v0 = vadd.f32 %v1280_v26, %v727_v63  ;;  %v1536_v1 = vpop.f32.mrb[26].mxu1  ;;  %1561 = vmatprep.mubr.bf16.mxu0 %v776_v61 }
 0x40d   :  { %v739_v2 = vadd.f32 %v1536_v1, %v1280_v26  ;;  %v730_v3 = vpop.f32.mrb[27].mxu1  ;;  %1562 = vmatmul.mubr.bf16.gmra.mrb[36].mxu0 %v777_v60  ;;  %v768_v5 = vmax.f32 %v736_v62, 0.0 }
 0x40e   :  { %v731_v4 = vadd.f32 %v1280_v26, %v730_v3  ;;  %v766_v7 = vmax.f32 %v728_v0, 0.0 }
 0x40f   :  { %v769_v6 = vmax.f32 %v739_v2, 0.0 }
 0x410   :  { %v767_v8 = vmax.f32 %v731_v4, 0.0 }
 0x411   :  { %v779_v9 = vpack.c.bf16 %v769_v6, %v768_v5 }
 0x412   :  { %v778_v10 = vpack.c.bf16 %v767_v8, %v766_v7  ;;  %v1539_v11 = vpop.f32.mrb[28].mxu1 }
 0x413   :  { %v752_v12 = vadd.f32 %v1539_v11, %v1280_v26  ;;  %v743_v13 = vpop.f32.mrb[29].mxu1 }
 0x414   :  { %v744_v14 = vadd.f32 %v1280_v26, %v743_v13  ;;  %v1540_v15 = vpop.f32.mrb[30].mxu1  ;;  %1565 = vmatprep.mubr.bf16.mxu0 %v778_v10 }
 0x415   :  { %v755_v17 = vadd.f32 %v1540_v15, %v1280_v26  ;;  %v746_v18 = vpop.f32.mrb[31].mxu1  ;;  %1566 = vmatmul.mubr.bf16.gmra.mrb[40].mxu0 %v779_v9  ;;  %v772_v20 = vmax.f32 %v752_v12, 0.0 }
 0x416   :  { %v747_v19 = vadd.f32 %v1280_v26, %v746_v18  ;;  %v770_v22 = vmax.f32 %v744_v14, 0.0 }
 0x417   :  { %v773_v21 = vmax.f32 %v755_v17, 0.0 }
 0x418   :  { %v771_v23 = vmax.f32 %v747_v19, 0.0 }
 0x419   :  { %v781_v24 = vpack.c.bf16 %v773_v21, %v772_v20 }
 0x41a   :  { %v780_v25 = vpack.c.bf16 %v771_v23, %v770_v22 }
 0x41c   :  { %1569 = vmatprep.mubr.bf16.mxu0 %v780_v25 }
 0x41d   :  { %1570 = vmatmul.mubr.bf16.gmra.mrb[44].mxu0 %v781_v24 }
 0x41e   :  { %1621 = vmatprep.mubr.msk.bf16.mxu0 %vm1801_vm0, %v1800_v57 }
 0x4d8   :  { %v1559_v27 = vpop.f32.mrb[32].mxu0 }
 0x4d9   :  { %v881_v28 = vpop.f32.mrb[33].mxu0 }
 0x4da   :  { %v1560_v29 = vpop.f32.mrb[34].mxu0 }
 0x4db   :  { %v945_v30 = vpack.c.bf16 %v1560_v29, %v1559_v27  ;;  %v884_v31 = vpop.f32.mrb[35].mxu0 }
 0x4dc   :  { %v944_v32 = vpack.c.bf16 %v884_v31, %v881_v28 }
 0x4de   :  { %1573 = vmatprep.subr.bf16.mxu1 %v944_v32 }
 0x4df   :  { %1574 = vmatpush3.bf16.msra.mxu1 %v944_v32 }
 0x4e0   :  { %v1563_v33 = vpop.f32.mrb[36].mxu0  ;;  %1575 = vmatprep.subr.bf16.mxu1 %v945_v30 }
 0x4e1   :  { %v897_v34 = vpop.f32.mrb[37].mxu0 }
 0x4e2   :  { %v1564_v26 = vpop.f32.mrb[38].mxu0 }
 0x4e3   :  { %v947_v35 = vpack.c.bf16 %v1564_v26, %v1563_v33  ;;  %v900_v16 = vpop.f32.mrb[39].mxu0  ;;  %1576 = vmatpush3.bf16.msra.mxu1 %v945_v30 }
 0x4e4   :  { %v946_v36 = vpack.c.bf16 %v900_v16, %v897_v34 }
 0x4e6   :  { %1577 = vmatprep.subr.bf16.mxu1 %v946_v36 }
 0x4e7   :  { %1578 = vmatpush3.bf16.msra.mxu1 %v946_v36 }
 0x4e8   :  { %v1567_v37 = vpop.f32.mrb[40].mxu0  ;;  %1579 = vmatprep.subr.bf16.mxu1 %v947_v35 }
 0x4e9   :  { %v913_v38 = vpop.f32.mrb[41].mxu0 }
 0x4ea   :  { %v1568_v39 = vpop.f32.mrb[42].mxu0 }
 0x4eb   :  { %v949_v40 = vpack.c.bf16 %v1568_v39, %v1567_v37  ;;  %v916_v41 = vpop.f32.mrb[43].mxu0  ;;  %1580 = vmatpush3.bf16.msra.mxu1 %v947_v35 }
 0x4ec   :  { %v948_v42 = vpack.c.bf16 %v916_v41, %v913_v38 }
 0x4ee   :  { %1581 = vmatprep.subr.bf16.mxu1 %v948_v42 }
 0x4ef   :  { %1582 = vmatpush3.bf16.msra.mxu1 %v948_v42 }
 0x4f0   :  { %v1571_v43 = vpop.f32.mrb[44].mxu0  ;;  %1583 = vmatprep.subr.bf16.mxu1 %v949_v40 }
 0x4f1   :  { %v929_v44 = vpop.f32.mrb[45].mxu0 }
 0x4f2   :  { %v1572_v45 = vpop.f32.mrb[46].mxu0 }
 0x4f3   :  { %v951_v46 = vpack.c.bf16 %v1572_v45, %v1571_v43  ;;  %v932_v54 = vpop.f32.mrb[47].mxu0  ;;  %1584 = vmatpush3.bf16.msra.mxu1 %v949_v40 }
 0x4f4   :  { %v950_v55 = vpack.c.bf16 %v932_v54, %v929_v44 }
 0x4f6   :  { %1585 = vmatprep.subr.bf16.mxu1 %v950_v55 }
 0x4f7   :  { %1586 = vmatpush3.bf16.msra.mxu1 %v950_v55 }
 0x4f8   :  { %1587 = vmatprep.subr.bf16.mxu1 %v951_v46 }
 0x4fb   :  { %1588 = vmatpush3.bf16.msra.mxu1 %v951_v46 }
 0x4fc   :  { %1625 = vmatprep.subr.bf16.mxu1 %v1800_v57 }
 0x4fe   :  { %1590 = vmatmul.mubr.bf16.vlgmr.msra.gmra.mrb[32].mxu1 %v1888_v47  ;;  %v1693_v47 = vld [vmem:[#allocation7 + $0xc0] sm:$0xff]  }
 0x4ff   :  { %1593 = vmatprep.mubr.bf16.mxu1 %v1890_v48  ;;  %1626 = vmatpush3.bf16.msra.mxu1 %v1693_v47  ;;  %v1694_v48 = vld [vmem:[#allocation7 + $0xc8] sm:$0xff]  }
 0x500   :  { %1627 = vmatprep.subr.bf16.mxu1 %v1800_v57 }
 0x503   :  { %1628 = vmatpush3.bf16.msra.mxu1 %v1694_v48  ;;  %v1078_v48 = vld [vmem:[%s1972_s2] sm:$0xf]  ;;  %s1767_s2 = scalar_lea.vmem %s1238_s14, 128 }
 0x504   :  { %1629 = vmatprep.subr.bf16.mxu1 %v1800_v57  ;;  %p1768_p10 = scmp.ne.s32.totalorder %s1238_s14, %s1767_s2  ;;  %p1773_p12 = scmp.lt.s32.totalorder %s1767_s2, %s1767_s2 }
 0x506   :  { %1594 = vmatmul.mubr.bf16.gmra.mrb[36].mxu1 %v1894_v49  ;;  %v1695_v49 = vld [vmem:[#allocation7 + $0xd0] sm:$0xff]   ;;  %p1774_p13 = por %p1773_p12, %p1772_p11 }
 0x507   :  { %1597 = vmatprep.mubr.bf16.mxu1 %v1896_v50  ;;  %1630 = vmatpush3.bf16.msra.mxu1 %v1695_v49  ;;  %v1696_v50 = vld [vmem:[#allocation7 + $0xd8] sm:$0xff]  }
 0x508   :  { %1631 = vmatprep.subr.bf16.mxu1 %v1800_v57  ;;  %v1700_v49 = vld [vmem:[#allocation7 + $0xf8] sm:$0xff]   ;;  %p1775_p0 = pnand %p1774_p13, %p1768_p10 }
 0x50b   :  { %1632 = vmatpush3.bf16.msra.mxu1 %v1696_v50 }
 0x50c   :  { %1633 = vmatprep.subr.bf16.mxu1 %v1800_v57 }
 0x50e   :  { %1598 = vmatmul.mubr.bf16.gmra.mrb[40].mxu1 %v1900_v51  ;;  %v1697_v51 = vld [vmem:[#allocation7 + $0xe0] sm:$0xff]  }
 0x50f   :  { %1601 = vmatprep.mubr.bf16.mxu1 %v1902_v52  ;;  %1634 = vmatpush3.bf16.msra.mxu1 %v1697_v51  ;;  %v1698_v52 = vld [vmem:[#allocation7 + $0xe8] sm:$0xff]  }
 0x510   :  { %1635 = vmatprep.subr.bf16.mxu1 %v1800_v57 }
 0x513   :  { %1636 = vmatpush3.bf16.msra.mxu1 %v1698_v52 }
 0x514   :  { %1637 = vmatprep.subr.bf16.mxu1 %v1800_v57 }
 0x516   :  { %1602 = vmatmul.mubr.bf16.gmra.mrb[44].mxu1 %v1906_v53  ;;  %v1699_v53 = vld [vmem:[#allocation7 + $0xf0] sm:$0xff]  }
 0x517   :  { %1641 = vmatprep.mubr.msk.bf16.mxu1 %vm1801_vm0, %v1800_v57  ;;  %1638 = vmatpush3.bf16.msra.mxu1 %v1699_v53 }
 0x518   :  { %1639 = vmatprep.subr.bf16.mxu1 %v1800_v57 }
 0x51b   :  { %1640 = vmatpush3.bf16.msra.mxu1 %v1700_v49 }
 0x5d1   :  { %v1591_v59 = vpop.f32.mrb[32].mxu1 }
 0x5d2   :  { %v1000_v60 = vadd.f32 %v1591_v59, %v1289_v58  ;;  %v991_v61 = vpop.f32.mrb[33].mxu1  ;;  %v1290_v59 = vld [vmem:[%s1974_s4 + $0x3] ss:$0 sm:$0xff] }
 0x5d3   :  { %v992_v56 = vadd.f32 %v1289_v58, %v991_v61  ;;  %v1592_v62 = vpop.f32.mrb[34].mxu1 }
 0x5d4   :  { %v1003_v63 = vadd.f32 %v1592_v62, %v1289_v58  ;;  %v994_v0 = vpop.f32.mrb[35].mxu1  ;;  %v1056_v2 = vmax.f32 %v1000_v60, 0.0 }
 0x5d5   :  { %v995_v1 = vadd.f32 %v1289_v58, %v994_v0  ;;  %v1054_v4 = vmax.f32 %v992_v56, 0.0 }
 0x5d6   :  { %v1057_v3 = vmax.f32 %v1003_v63, 0.0 }
 0x5d7   :  { %v1055_v5 = vmax.f32 %v995_v1, 0.0 }
 0x5d8   :  { %v1071_v6 = vpack.c.bf16 %v1057_v3, %v1056_v2 }
 0x5d9   :  { %v1070_v7 = vpack.c.bf16 %v1055_v5, %v1054_v4  ;;  %v1595_v8 = vpop.f32.mrb[36].mxu1 }
 0x5da   :  { %v1016_v9 = vadd.f32 %v1595_v8, %v1289_v58  ;;  %v1007_v10 = vpop.f32.mrb[37].mxu1 }
 0x5db   :  { %v1008_v11 = vadd.f32 %v1289_v58, %v1007_v10  ;;  %v1596_v12 = vpop.f32.mrb[38].mxu1  ;;  %1606 = vmatpush3.bf16.msra.mxu0 %v1070_v7 }
 0x5dc   :  { %v1019_v13 = vadd.f32 %v1596_v12, %v1289_v58  ;;  %v1010_v14 = vpop.f32.mrb[39].mxu1  ;;  %1607 = vmatprep.subr.bf16.mxu0 %v1800_v57  ;;  %v1060_v17 = vmax.f32 %v1016_v9, 0.0 }
 0x5dd   :  { %v1011_v15 = vadd.f32 %v1289_v58, %v1010_v14  ;;  %v1058_v19 = vmax.f32 %v1008_v11, 0.0 }
 0x5de   :  { %v1061_v18 = vmax.f32 %v1019_v13, 0.0 }
 0x5df   :  { %v1059_v20 = vmax.f32 %v1011_v15, 0.0  ;;  %1608 = vmatpush3.bf16.msra.mxu0 %v1071_v6 }
 0x5e0   :  { %v1073_v21 = vpack.c.bf16 %v1061_v18, %v1060_v17  ;;  %1609 = vmatprep.subr.bf16.mxu0 %v1800_v57 }
 0x5e1   :  { %v1072_v22 = vpack.c.bf16 %v1059_v20, %v1058_v19  ;;  %v1599_v23 = vpop.f32.mrb[40].mxu1 }
 0x5e2   :  { %v1032_v24 = vadd.f32 %v1599_v23, %v1289_v58  ;;  %v1023_v25 = vpop.f32.mrb[41].mxu1 }
 0x5e3   :  { %v1024_v27 = vadd.f32 %v1289_v58, %v1023_v25  ;;  %v1600_v28 = vpop.f32.mrb[42].mxu1  ;;  %1610 = vmatpush3.bf16.msra.mxu0 %v1072_v22 }
 0x5e4   :  { %v1035_v29 = vadd.f32 %v1600_v28, %v1289_v58  ;;  %v1026_v30 = vpop.f32.mrb[43].mxu1  ;;  %1611 = vmatprep.subr.bf16.mxu0 %v1800_v57  ;;  %v1064_v32 = vmax.f32 %v1032_v24, 0.0 }
 0x5e5   :  { %v1027_v31 = vadd.f32 %v1289_v58, %v1026_v30  ;;  %v1062_v34 = vmax.f32 %v1024_v27, 0.0 }
 0x5e6   :  { %v1065_v33 = vmax.f32 %v1035_v29, 0.0 }
 0x5e7   :  { %v1063_v26 = vmax.f32 %v1027_v31, 0.0  ;;  %1612 = vmatpush3.bf16.msra.mxu0 %v1073_v21 }
 0x5e8   :  { %v1075_v35 = vpack.c.bf16 %v1065_v33, %v1064_v32  ;;  %1613 = vmatprep.subr.bf16.mxu0 %v1800_v57 }
 0x5e9   :  { %v1074_v16 = vpack.c.bf16 %v1063_v26, %v1062_v34  ;;  %v1603_v36 = vpop.f32.mrb[44].mxu1 }
 0x5ea   :  { %v1048_v37 = vadd.f32 %v1603_v36, %v1289_v58  ;;  %v1039_v38 = vpop.f32.mrb[45].mxu1 }
 0x5eb   :  { %v1040_v39 = vadd.f32 %v1289_v58, %v1039_v38  ;;  %v1604_v40 = vpop.f32.mrb[46].mxu1  ;;  %1614 = vmatpush3.bf16.msra.mxu0 %v1074_v16 }
 0x5ec   :  { %v1051_v41 = vadd.f32 %v1604_v40, %v1289_v58  ;;  %v1042_v42 = vpop.f32.mrb[47].mxu1  ;;  %1615 = vmatprep.subr.bf16.mxu0 %v1800_v57  ;;  %v1068_v44 = vmax.f32 %v1048_v37, 0.0 }
 0x5ed   :  { %v1043_v43 = vadd.f32 %v1289_v58, %v1042_v42  ;;  %v1066_v46 = vmax.f32 %v1040_v39, 0.0 }
 0x5ee   :  { %v1069_v45 = vmax.f32 %v1051_v41, 0.0 }
 0x5ef   :  { %v1067_v54 = vmax.f32 %v1043_v43, 0.0  ;;  %1616 = vmatpush3.bf16.msra.mxu0 %v1075_v35 }
 0x5f0   :  { %v1077_v55 = vpack.c.bf16 %v1069_v45, %v1068_v44  ;;  %1617 = vmatprep.subr.bf16.mxu0 %v1800_v57 }
 0x5f1   :  { %v1076_v47 = vpack.c.bf16 %v1067_v54, %v1066_v46 }
 0x5f3   :  { %1618 = vmatpush3.bf16.msra.mxu0 %v1076_v47 }
 0x5f4   :  { %1619 = vmatprep.subr.bf16.mxu0 %v1800_v57 }
 0x5f7   :  { %1620 = vmatpush3.bf16.msra.mxu0 %v1077_v55 }
 0x5fa   :  { %1622 = vmatmul.mubr.bf16.vlgmr.msra.gmra.mrb[48].mxu0 %v1078_v48 }
 0x6cd   :  { %v1113_v50 = vpop.f32.mrb[48].mxu0 }
 0x6ce   :  { %v1119_v51 = vpack.c.bf16 %v1113_v50, %v1113_v50  ;;  %v1623_v52 = vpop.f32.mrb[49].mxu0 }
 0x6cf   :  { %v1116_v53 = vpop.f32.mrb[50].mxu0 }
 0x6d0   :  { %v1624_v58 = vpop.f32.mrb[51].mxu0  ;;  %1642 = vmatmul.mubr.bf16.vlgmr.msra.gmra.mrb[48].mxu1 %v1119_v51 }
 0x7a3   :  { %v1224_v57 = vpop.f32.mrb[48].mxu1 }
 0x7a4   :  { %v1225_v60 = vadd.f32 %v1290_v59, %v1224_v57  ;;  %v1643_v61 = vpop.f32.mrb[49].mxu1 }
 0x7a5   :  { %v1227_v56 = vpop.f32.mrb[50].mxu1 }
 0x7a6   :  { %1230 = vst [vmem:[#allocation8] sm:$0xff] %v1225_v60  ;;  %v1644_v62 = vpop.f32.mrb[51].mxu1 }
 0x7a7   :  { %1778 = shalt.err (!%p1775_p0)
}
 0x7a8   :  { %s1779_s4 = scalar_lea.hbm %s1975_s5, 128 }
 0x7a9   :  { %p1780_p1 = scmp.ne.s32.totalorder %s1975_s5, %s1779_s4  ;;  %p1783_p2 = scmp.lt.u32.totalorder %s1779_s4, %s1975_s5 }
 0x7ab   :  { %p1785_p3 = pnand %p1783_p2, %p1780_p1 }
 0x7ad   :  { %1788 = shalt.err (!%p1785_p3)
}
 0x7ae   :  { %1240 = dma.vmem_to_hbm [thread:$0]  %s1238_s14, 128, %s1975_s5, [#allocation4]  }
 0x7af   :  { %1793 = dma.done.wait [#allocation4], 128  }
 0x7b0   :  { %1794 = vsyncadd [#allocation4], 4294967168 }
 0x7b1   :  { %1244 = vsyncpa [#allocation3], 1 }
 0x7b2   :  { %1245 = vsyncpa [#allocation6], 1 }
 0x7b3   :  { %1246 = vsyncpa [#allocation4], 1 }

</bundles_post_ra>
